<compile_context>
chip_gen: v6e
topology: v6e:2x2x1
jax: 0.10.0
libtpu: 0.0.40
codegen_flags: <defaults>
</compile_context>

<pallas_src>
import functools

import jax
import jax.numpy as jnp
from jax import lax
from jax.experimental import pallas as pl
from jax.experimental.pallas import tpu as pltpu


# ---------------------------------------------------------------------------
# pltpu.roll convention probe
# ---------------------------------------------------------------------------
_ROLL_IS_JNP = None


def _probe_roll_is_jnp():
    """pltpu.roll follows jnp.roll semantics (result[p] = src[p - shift]);
    probe once on-device so the conv-tap shifts stay correct even if the
    rotate convention ever drifts across JAX versions."""
    global _ROLL_IS_JNP
    if _ROLL_IS_JNP is None:
        def probe(x_ref, o_ref):
            o_ref[...] = pltpu.roll(x_ref[...], shift=1, axis=1)

        x = jnp.tile(jnp.arange(128, dtype=jnp.float32)[None, :], (8, 1))
        y = pl.pallas_call(
            probe, out_shape=jax.ShapeDtypeStruct((8, 128), jnp.float32))(x)
        _ROLL_IS_JNP = bool(y[0, 1] == x[0, 0])
    return _ROLL_IS_JNP


# ---------------------------------------------------------------------------
# Fused Pallas kernel: entire DnCNN_NL forward for one batch element
# ---------------------------------------------------------------------------
def _dncnn_nl_kernel(H, W, Cin, Cbn, Cm, nb1, nb2, roll_is_jnp,
                     x_ref, w1_ref, b1_ref,
                     bw1_ref, bs1_ref, bb1_ref,
                     wt_ref, wp_ref, wg_ref, wo_ref, bo_ref,
                     bw2_ref, bs2_ref, bb2_ref,
                     wl_ref, bl_ref,
                     o_ref,
                     act_ref, patch_ref):
    HW = H * W
    f32 = jnp.float32
    bf16 = jnp.bfloat16

    # ---- hoisted (loop-invariant) boundary masks for the 9 conv taps -------
    lane = lax.broadcasted_iota(jnp.int32, (1, HW), 1)
    col = lane % W
    row = lane // W
    offs, masks = [], []
    for k in range(9):
        kh, kw = divmod(k, 3)
        dy, dx = kh - 1, kw - 1
        offs.append(dy * W + dx)
        parts = []
        if dy == -1:
            parts.append(row >= 1)
        if dy == 1:
            parts.append(row <= H - 2)
        if dx == -1:
            parts.append(col >= 1)
        if dx == 1:
            parts.append(col <= W - 2)
        m = None
        for p in parts:
            m = p if m is None else jnp.logical_and(m, p)
        masks.append(m)          # None => no masking needed (center tap)

    def lane_shift(src, off):
        """result[:, p] = src[:, p + off] (wrap-around, masked by caller)."""
        if off == 0:
            return src
        s = ((-off) if roll_is_jnp else off) % HW
        return pltpu.roll(src, shift=s, axis=1)

    def tap(src, k):
        t = lane_shift(src, offs[k])
        m = masks[k]
        return t if m is None else jnp.where(m, t, 0.0)

    def fill_patches(src):
        # im2col into the persistent bf16 VMEM buffer; nine sublane-aligned
        # (offset k*Cbn) full-lane stores, reused by every conv layer.
        for k in range(9):
            patch_ref[k * Cbn:(k + 1) * Cbn, :] = tap(src, k).astype(bf16)

    # ---- first conv (bias) + ReLU ------------------------------------------
    xf = x_ref[...].reshape(Cin, HW).astype(f32)        # residual, lane-dense
    if Cin == 1:
        # Contraction depth 1: nine broadcast FMAs on the VPU beat the MXU.
        acc = jnp.zeros((Cbn, HW), f32)
        for k in range(9):
            acc = acc + w1_ref[:, k:k + 1] * tap(xf, k)
    else:
        p0 = jnp.concatenate([tap(xf, k).astype(bf16) for k in range(9)], axis=0)
        acc = jnp.dot(w1_ref[...], p0, preferred_element_type=f32)
    act_ref[...] = jnp.maximum(acc + b1_ref[...], 0.0)

    # ---- conv-bn-relu stacks (bf16 MXU operands, f32 accumulation) ---------
    def conv_bn_relu(w_bf16, scale, bias):
        fill_patches(act_ref[...])
        y = jnp.dot(w_bf16, patch_ref[...], preferred_element_type=f32)
        act_ref[...] = jnp.maximum(y * scale + bias, 0.0)

    for i in range(nb1):
        conv_bn_relu(bw1_ref[i], bs1_ref[i], bb1_ref[i])

    # ---- non-local block (embedded-Gaussian attention, residual) -----------
    # TODO(synk): common.NonLocalLayer_dilation source is not provided; a
    # standard embedded-Gaussian non-local block (with residual) stands in.
    # TODO(synk): flash-tile (online softmax over key blocks) before scaling
    # H*W — the full (HW,HW) matrix is fine only at these small sizes.
    a = act_ref[...]                                     # (Cbn, HW) f32
    a_bf = a.astype(bf16)
    theta = jnp.dot(wt_ref[...], a_bf, preferred_element_type=f32)   # (Cm, HW)
    phi = jnp.dot(wp_ref[...], a_bf, preferred_element_type=f32)     # (Cm, HW)
    g = jnp.dot(wg_ref[...], a_bf, preferred_element_type=f32)       # (Cm, HW)
    att = lax.dot_general(theta.astype(bf16), phi.astype(bf16),
                          (((0,), (0,)), ((), ())),
                          preferred_element_type=f32)                # (HW, HW)
    m = jnp.max(att, axis=-1, keepdims=True)
    p = jnp.exp(att - m)
    attn = p * pl.reciprocal(jnp.sum(p, axis=-1, keepdims=True), approx=True)
    # attn fed MXU-native (LHS, lane-dim contraction) -> no HWxHW transpose;
    # only the tiny (Cm,HW)/(HW,Cm) operands get re-oriented.
    yvt = lax.dot_general(attn.astype(bf16), g.astype(bf16),
                          (((1,), (1,)), ((), ())),
                          preferred_element_type=f32)                # (HW, Cm)
    z = lax.dot_general(wo_ref[...], yvt.astype(bf16),
                        (((1,), (1,)), ((), ())),
                        preferred_element_type=f32) + bo_ref[...]    # (Cbn, HW)
    act_ref[...] = a + z

    for i in range(nb2):
        conv_bn_relu(bw2_ref[i], bs2_ref[i], bb2_ref[i])

    # ---- last conv (bias) + residual ----------------------------------------
    fill_patches(act_ref[...])
    if Cin == 1:
        # Output width 1: elementwise multiply + sublane reduce (VPU/XLU)
        # instead of a 1-column MXU matmul.
        y = jnp.sum(patch_ref[...].astype(f32) * wl_ref[...],
                    axis=0, keepdims=True)                           # (1, HW)
    else:
        y = jnp.dot(wl_ref[...], patch_ref[...], preferred_element_type=f32)
    o_ref[...] = (y + bl_ref[...] + xf).reshape(1, Cin, HW).astype(o_ref.dtype)


# ---------------------------------------------------------------------------
# Wrapper: weight re-layout + pallas_call plumbing
# ---------------------------------------------------------------------------
def dncnn_nl_forward(x_nchw, params):
    x = x_nchw.astype(jnp.float32)
    N, Cin, H, W = x.shape
    HW = H * W
    Cbn = params["conv1_w"].shape[-1]
    Cm = params["nl_wt"].shape[-1]
    nb1 = len(params["blocks1"])
    nb2 = len(params["blocks2"])

    f32, bf16 = jnp.float32, jnp.bfloat16

    def stack_conv(w, dtype):
        # (3,3,ci,co) HWIO -> (co, 9*ci), tap-major (matches im2col ordering).
        co = w.shape[-1]
        return jnp.transpose(w, (3, 0, 1, 2)).reshape(co, -1).astype(dtype)

    # First conv: VPU path for Cin==1 keeps f32 weights (no bf16 VPU on v5e).
    w1 = stack_conv(params["conv1_w"], f32 if Cin == 1 else bf16)
    b1 = params["conv1_b"].reshape(Cbn, 1).astype(f32)

    def stack_blocks(blocks):
        ws = jnp.stack([stack_conv(b["w"], bf16) for b in blocks])
        ss = jnp.stack([b["scale"].reshape(Cbn, 1) for b in blocks]).astype(f32)
        bs = jnp.stack([b["bias"].reshape(Cbn, 1) for b in blocks]).astype(f32)
        return ws, ss, bs

    bw1, bs1, bb1 = stack_blocks(params["blocks1"])
    bw2, bs2, bb2 = stack_blocks(params["blocks2"])

    wt = params["nl_wt"].T.astype(bf16)                  # (Cm, Cbn)
    wp = params["nl_wp"].T.astype(bf16)                  # (Cm, Cbn)
    wg = params["nl_wg"].T.astype(bf16)                  # (Cm, Cbn)
    wo = params["nl_wo"].T.astype(bf16)                  # (Cbn, Cm)
    bo = params["nl_bo"].reshape(Cbn, 1).astype(f32)

    if Cin == 1:
        wl = params["conv_last_w"].reshape(9 * Cbn, 1).astype(f32)
    else:
        wl = stack_conv(params["conv_last_w"], bf16)     # (Cin, 9*Cbn)
    bl = params["conv_last_b"].reshape(Cin, 1).astype(f32)

    x_flat = x.reshape(N, Cin, HW)                       # lane-dense input

    kernel = functools.partial(_dncnn_nl_kernel, H, W, Cin, Cbn, Cm, nb1, nb2,
                               _probe_roll_is_jnp())

    def full_spec(a):
        return pl.BlockSpec(a.shape, lambda n: (0,) * a.ndim)

    args = (x_flat, w1, b1, bw1, bs1, bb1, wt, wp, wg, wo, bo,
            bw2, bs2, bb2, wl, bl)
    in_specs = ([pl.BlockSpec((1, Cin, HW), lambda n: (n, 0, 0))]
                + [full_spec(a) for a in args[1:]])

    out = pl.pallas_call(
        kernel,
        out_shape=jax.ShapeDtypeStruct((N, Cin, HW), jnp.float32),
        grid=(N,),
        in_specs=in_specs,
        out_specs=pl.BlockSpec((1, Cin, HW), lambda n: (n, 0, 0)),
        scratch_shapes=[
            pltpu.VMEM((Cbn, HW), jnp.float32),          # resident activation
            pltpu.VMEM((9 * Cbn, HW), jnp.bfloat16),     # persistent im2col
        ],
        compiler_params=pltpu.CompilerParams(
            dimension_semantics=("parallel",)),
    )(*args)

    return out.reshape(N, Cin, H, W)                     # back to NCHW


# ---------------------------------------------------------------------------
# Model: parameter init (BN folded to inference-mode affine)
# ---------------------------------------------------------------------------
_BN_EPS = 1e-5


def _fold_bn(gamma, beta, mean, var):
    scale = gamma / jnp.sqrt(var + _BN_EPS)
    shift = beta - mean * scale
    return scale, shift


def init_params(key, in_channels=1, bn_channels=16, depth=4):
    inter = bn_channels // 2
    p = {}
    n_keys = 4 + 5 * depth + 5
    keys = iter(jax.random.split(key, n_keys))

    # first conv (with bias) + ReLU
    p["conv1_w"] = 0.1 * jax.random.normal(next(keys), (3, 3, in_channels, bn_channels))
    p["conv1_b"] = 0.1 * jax.random.normal(next(keys), (bn_channels,))

    def make_block():
        w = 0.05 * jax.random.normal(next(keys), (3, 3, bn_channels, bn_channels))
        gamma = jax.random.uniform(next(keys), (bn_channels,), minval=0.5, maxval=1.5)
        beta = 0.1 * jax.random.normal(next(keys), (bn_channels,))
        mean = 0.1 * jax.random.normal(next(keys), (bn_channels,))
        var = jax.random.uniform(next(keys), (bn_channels,), minval=0.5, maxval=1.5)
        scale, shift = _fold_bn(gamma, beta, mean, var)
        return {"w": w, "scale": scale, "bias": shift}

    p["blocks1"] = [make_block() for _ in range(depth // 2)]

    # non-local layer (embedded-Gaussian stand-in for NonLocalLayer_dilation)
    p["nl_wt"] = 0.1 * jax.random.normal(next(keys), (bn_channels, inter))
    p["nl_wp"] = 0.1 * jax.random.normal(next(keys), (bn_channels, inter))
    p["nl_wg"] = 0.1 * jax.random.normal(next(keys), (bn_channels, inter))
    p["nl_wo"] = 0.1 * jax.random.normal(next(keys), (inter, bn_channels))
    p["nl_bo"] = 0.1 * jax.random.normal(next(keys), (bn_channels,))

    p["blocks2"] = [make_block() for _ in range(depth // 2)]

    # final conv (with bias), no activation
    p["conv_last_w"] = 0.05 * jax.random.normal(next(keys), (3, 3, bn_channels, in_channels))
    p["conv_last_b"] = 0.1 * jax.random.normal(next(keys), (in_channels,))
    return p


# ---------------------------------------------------------------------------
if __name__ == "__main__":
    key = jax.random.PRNGKey(0)
    k_x, k_p = jax.random.split(key)

    N, C_IN, H, W = 2, 1, 16, 16
    BN_CH, DEPTH = 16, 4

    x = jax.random.normal(k_x, (N, C_IN, H, W), dtype=jnp.float32)
    params = init_params(k_p, in_channels=C_IN, bn_channels=BN_CH, depth=DEPTH)

    out = dncnn_nl_forward(x, params)
    out = jax.block_until_ready(out)

    assert out.shape == (N, C_IN, H, W), out.shape
    assert bool(jnp.all(jnp.isfinite(out)))
    print("KERNEL_OK")
</pallas_src>

<mosaic_0001>
module attributes {stable_mosaic.version = 11 : i64} {
  func.func @probe(%arg0: memref<8x128xf32, #tpu.memory_space<vmem>>, %arg1: memref<8x128xf32, #tpu.memory_space<vmem>>) attributes {dimension_semantics = [], scalar_prefetch = 0 : i64, scratch_operands = 0 : i64, tpu.core_type = #tpu.core_type<tc>} {
    %c0 = arith.constant 0 : index
    %c0_0 = arith.constant 0 : index
    %0 = vector.load %arg0[%c0, %c0_0] : memref<8x128xf32, #tpu.memory_space<vmem>>, vector<8x128xf32>
    %c1_i32 = arith.constant 1 : i32
    %1 = tpu.dynamic_rotate %0 by %c1_i32 dim 1 : vector<8x128xf32>, i32 -> vector<8x128xf32>
    %c0_1 = arith.constant 0 : index
    %c0_2 = arith.constant 0 : index
    %2 = vector.load %arg1[%c0_1, %c0_2] : memref<8x128xf32, #tpu.memory_space<vmem>>, vector<8x128xf32>
    tpu.vector_store %arg1[%c0_1, %c0_2], %1 {strides = array<i32>} : memref<8x128xf32, #tpu.memory_space<vmem>>, vector<8x128xf32>,
    return
  }
}

</mosaic_0001>

<bundles_post_ra>
// kernel: tpu_custom_call.1
= control target key start
LH: loop header
LB: loop body
LE: loop exit
PB: predicated region body
PF: predicated region fallthrough
CT: control target
= control target key end

     0   :  { %6 = vsyncpa [#allocation3], 0  ;;  %s106_s0 = inlined_call_operand.hbm [shape: f32[8,128], index: 0, kind: input, shape index: {}]   ;;  %s107_s1 = inlined_call_operand.hbm [shape: f32[8,128], index: 1, kind: output, shape index: {}]  }
   0x1   :  { %7 = vsyncpa [#allocation4], 0  ;;  %s87_s6 = smov [#allocation2]  }
   0x2   :  { %s14_s7 = sshll.u32 %s87_s6, 4  ;;  %s15_s7 = int_to_ptr.vmem [resolvable:$true] %s14_s7 }
   0x3   :  { %s51_s8 = scalar_lea.vmem %s15_s7, 128  ;;  %p56_p1 = scmp.lt.s32.totalorder %s15_s7, %s15_s7 }
   0x4   :  { %p52_p0 = scmp.ne.s32.totalorder %s15_s7, %s51_s8  ;;  %p57_p2 = scmp.lt.s32.totalorder %s51_s8, %s51_s8 }
   0x6   :  { %p58_p3 = por %p57_p2, %p56_p1 }
   0x8   :  { %p59_p4 = pnand %p58_p3, %p52_p0 }
   0xa   :  { %62 = shalt.err (!%p59_p4)
}
   0xb   :  { %17 = dma.hbm_to_vmem [thread:$0]  %s106_s0, 128, %s15_s7, [#allocation3]  }
   0xc   :  { %83 = dma.done.wait [#allocation3], 128  }
   0xd   :  { %84 = vsyncadd [#allocation3], 4294967168  ;;  %v21_v0 = vld [vmem:[#allocation2] sm:$0xff]  ;;  %s88_s11 = smov 1   ;;  %s89_s12 = smov [#allocation5]  }
   0xe   :  { %22 = vrot.lane.b32.xlu0 %v21_v0, %s88_s11  ;;  %s31_s13 = sshll.u32 %s89_s12, 4  ;;  %s32_s13 = int_to_ptr.vmem [resolvable:$true] %s31_s13 }
   0xf   :  { %s63_s14 = scalar_lea.vmem %s32_s13, 128  ;;  %p68_p6 = scmp.lt.s32.totalorder %s32_s13, %s32_s13 }
  0x10   :  { %p64_p5 = scmp.ne.s32.totalorder %s32_s13, %s63_s14  ;;  %p69_p7 = scmp.lt.s32.totalorder %s63_s14, %s63_s14 }
  0x12   :  { %p70_p8 = por %p69_p7, %p68_p6 }
  0x14   :  { %p71_p9 = pnand %p70_p8, %p64_p5 }
  0x80   :  { %v23_v1 = vpop.permute.xlu0 %22 }
  0x81   :  { %24 = vst [vmem:[#allocation5] sm:$0xff] %v23_v1 }
  0x82   :  { %74 = shalt.err (!%p71_p9)
}
  0x83   :  { %34 = dma.vmem_to_hbm [thread:$0]  %s32_s13, 128, %s107_s1, [#allocation4]  }
  0x84   :  { %85 = dma.done.wait [#allocation4], 128  }
  0x85   :  { %86 = vsyncadd [#allocation4], 4294967168 }
  0x86   :  { %38 = vsyncpa [#allocation3], 1 }
  0x87   :  { %39 = vsyncpa [#allocation4], 1 }

</bundles_post_ra>
